<compile_context>
chip_gen: v6e
topology: v6e:2x2x1
jax: 0.10.0
libtpu: 0.0.40
codegen_flags: <defaults>
</compile_context>

<pallas_src>
import functools

import jax
import jax.numpy as jnp
from jax.experimental import pallas as pl
from jax.experimental.pallas import tpu as pltpu


# -----------------------------------------------------------------------------
# Fused kernel: mean-xent(logits) partial + grad-L2(penalty) partial per N tile
# -----------------------------------------------------------------------------
def _fused_loss_kernel(tgt_ref, logits_ref, x_ref, w_ref, b_ref, gram_ref,
                       xent_ref, pen_ref, pred_acc,
                       *, tile_d, d_total, w_resident):
    j = pl.program_id(1)
    nd = pl.num_programs(1)

    # ---- init the per-N-tile pred accumulator at the first D step
    @pl.when(j == 0)
    def _():
        pred_acc[...] = jnp.zeros_like(pred_acc)

    # ---- X is streamed in its HBM source dtype; cast to bf16 here (hidden under DMA)
    x = x_ref[...]
    if d_total % tile_d != 0:
        # Ragged last D tile: the out-of-bounds lanes of this block are unspecified
        # bits, so zero-mask them (zero-padded W rows alone are unsafe: NaN * 0 = NaN).
        lane = jax.lax.broadcasted_iota(jnp.int32, x.shape, 1)
        valid = jnp.minimum(d_total - j * tile_d, tile_d)
        x = jnp.where(lane < valid, x, 0)
    x = x.astype(jnp.bfloat16)

    if w_resident:
        # Whole (padded) W lives in VMEM once; slice the current D chunk.
        start = pl.multiple_of(j * tile_d, 128)
        w = w_ref[pl.ds(start, tile_d), :]
    else:
        w = w_ref[...]

    # ---- f32 accumulation on the MXU
    pred_acc[...] += jnp.dot(x, w, preferred_element_type=jnp.float32)

    # ---- finalize this N tile on the last D step
    @pl.when(j == nd - 1)
    def _():
        tn, c = logits_ref.shape

        # one-hot built on-chip from int32 targets (no [N, C] one-hot in HBM)
        # TODO(synk): no ignore_index / out-of-range target handling (PyTorch differs).
        tgt = tgt_ref[...]                                          # (tn, 1) int32
        class_ids = jax.lax.broadcasted_iota(jnp.int32, (tn, c), 1)
        onehot = (class_ids == tgt).astype(jnp.float32)             # (tn, c)

        # mean-xent term over the provided logits (sum here, divided by N in wrapper)
        logits = logits_ref[...].astype(jnp.float32)
        m = jnp.max(logits, axis=-1, keepdims=True)
        lse = m + jnp.log(jnp.sum(jnp.exp(logits - m), axis=-1, keepdims=True))
        xent_tile = jnp.sum(lse - jnp.sum(onehot * logits, axis=-1, keepdims=True))

        # grad-L2 term via the Gram form: sum(g^2) = sum((diff @ G) * diff)
        pred = pred_acc[...] + b_ref[...].astype(jnp.float32)       # (tn, c)
        pm = jnp.max(pred, axis=-1, keepdims=True)
        e = jnp.exp(pred - pm)
        sm = e / jnp.sum(e, axis=-1, keepdims=True)                 # f32 softmax
        diff = sm - onehot
        q = jnp.dot(diff, gram_ref[...], preferred_element_type=jnp.float32)
        pen_tile = jnp.sum(q * diff)

        # lane-dense scalar broadcast into the per-N-tile partial outputs
        xent_ref[...] = jnp.zeros(xent_ref.shape, jnp.float32) + xent_tile
        pen_ref[...] = jnp.zeros(pen_ref.shape, jnp.float32) + pen_tile


# -----------------------------------------------------------------------------
# Tiling helpers
# -----------------------------------------------------------------------------
def _pick_tile_n(n):
    # Prefer >= 2 N tiles (only the "parallel" grid axis is sharded across the two
    # TensorCores on v7x), tile_n a multiple of 8, capped at 256 to bound VMEM.
    for cand in (256, 128, 64, 32, 16, 8):
        if cand < n and n % cand == 0:
            return cand
    return n  # tiny or awkward batch: single tile covering the whole batch
    # TODO(synk): a ragged last N tile would need row masking in xent / softmax sums.


def _vmem_budget_bytes():
    # Per-generation scoped-VMEM budget: ~3/4 of physical, capped at 100 MiB
    # (v5e/v6e: 128 MiB -> 96 MiB; v7x: 64 MiB -> 48 MiB).  Conservative fallback.
    try:
        cap = pltpu.get_tpu_info().vmem_capacity_bytes
    except Exception:
        cap = 64 * 1024 * 1024
    return int(min(cap * 3 // 4, 100 * 1024 * 1024))


# -----------------------------------------------------------------------------
# Module-equivalent forward
# -----------------------------------------------------------------------------
def xent_avg_gradl2_loss(logits, imgs, target, w, b, gradl2_weight,
                         training=True, tile_d=16384):
    n = imgs.shape[0]
    num_classes = logits.shape[1]
    logits_f32 = logits.astype(jnp.float32)

    if not training:
        # Eval path (no grad penalty): plain-XLA mean cross-entropy (not the hot path).
        onehot = jax.nn.one_hot(target, num_classes, dtype=jnp.float32)
        logp = jax.nn.log_softmax(logits_f32, axis=-1)
        return -jnp.mean(jnp.sum(onehot * logp, axis=-1))

    # torch .view(n, -1): metadata reshape only.  No dtype cast, no padding of the big
    # [N, D] image tensor -- it is streamed straight out of HBM in its source dtype.
    x = imgs.reshape(n, -1)
    d = x.shape[1]
    x_bytes = x.dtype.itemsize

    # --- tiling -------------------------------------------------------------
    tile_n = _pick_tile_n(n)
    assert n % tile_n == 0
    n_tiles_n = n // tile_n

    budget = _vmem_budget_bytes()
    # Per-D-column VMEM cost of the double-buffered X (+ streamed W) pipeline; keep
    # that stream under ~half the scoped-VMEM budget.
    bytes_per_d = 2 * (tile_n * x_bytes + num_classes * 2)
    max_tile_d = max(128, (budget // 2) // bytes_per_d)

    if int(tile_d) >= d:
        tile_d_eff = d                                   # single D tile
    else:
        tile_d_eff = max(128, (min(int(tile_d), max_tile_d) // 128) * 128)
        tile_d_eff = min(tile_d_eff, d)
    n_tiles_d = pl.cdiv(d, tile_d_eff)
    d_pad = n_tiles_d * tile_d_eff

    # W is tiny [D, C]: bf16-cast + zero-pad host-side (X itself is never touched).
    w_bf16 = w.astype(jnp.bfloat16)
    if d_pad != d:
        w_bf16 = jnp.pad(w_bf16, ((0, d_pad - d), (0, 0)))

    # Tiny exact-f32 Gram matrix [C, C]:  sum(g^2) = sum((diff @ G) * diff).
    w_f32 = w.astype(jnp.float32)
    gram = w_f32.T @ w_f32

    b_row = b.reshape(1, num_classes).astype(jnp.float32)
    tgt2d = target.reshape(n, 1).astype(jnp.int32)

    # Hold W resident in VMEM (one DMA total, sliced per D step) when it is small;
    # otherwise stream (tile_d, C) blocks per grid step as before.
    w_resident = (n_tiles_d > 1 and
                  2 * d_pad * num_classes * 2 <= min(8 * 1024 * 1024, budget // 4))
    if w_resident:
        w_spec = pl.BlockSpec((d_pad, num_classes), lambda i, j: (0, 0))
    else:
        w_spec = pl.BlockSpec((tile_d_eff, num_classes), lambda i, j: (j, 0))

    kernel = functools.partial(
        _fused_loss_kernel,
        tile_d=tile_d_eff, d_total=d, w_resident=w_resident)

    xent_part, pen_part = pl.pallas_call(
        kernel,
        out_shape=(
            jax.ShapeDtypeStruct((n_tiles_n, 8, 128), jnp.float32),
            jax.ShapeDtypeStruct((n_tiles_n, 8, 128), jnp.float32),
        ),
        grid=(n_tiles_n, n_tiles_d),
        in_specs=[
            pl.BlockSpec((tile_n, 1), lambda i, j: (i, 0)),                 # targets (int32)
            pl.BlockSpec((tile_n, num_classes), lambda i, j: (i, 0)),       # logits (f32)
            pl.BlockSpec((tile_n, tile_d_eff), lambda i, j: (i, j)),        # X (source dtype)
            w_spec,                                                         # W (bf16)
            pl.BlockSpec((1, num_classes), lambda i, j: (0, 0)),            # b (f32)
            pl.BlockSpec((num_classes, num_classes), lambda i, j: (0, 0)),  # Gram (f32)
        ],
        out_specs=(
            pl.BlockSpec((1, 8, 128), lambda i, j: (i, 0, 0)),
            pl.BlockSpec((1, 8, 128), lambda i, j: (i, 0, 0)),
        ),
        scratch_shapes=[pltpu.VMEM((tile_n, num_classes), jnp.float32)],    # pred accumulator
        compiler_params=pltpu.CompilerParams(
            # N tiles are independent -> shard across both TCs on v7x megacore;
            # D is the accumulated reduction axis (innermost).
            dimension_semantics=("parallel", "arbitrary"),
            vmem_limit_bytes=budget,
        ),
    )(tgt2d, logits_f32, x, w_bf16, b_row, gram)

    xent_loss = jnp.sum(xent_part[:, 0, 0]) / jnp.float32(n)
    grad_pen = jnp.sum(pen_part[:, 0, 0]) / jnp.float32(n)
    return xent_loss + jnp.float32(gradl2_weight) * grad_pen


# -----------------------------------------------------------------------------
# Pure-JAX reference (uses jax.grad through the same linear model, all f32)
# -----------------------------------------------------------------------------
def _reference(logits, imgs, target, w, b, gradl2_weight):
    n = imgs.shape[0]
    num_classes = logits.shape[1]
    onehot = jax.nn.one_hot(target, num_classes, dtype=jnp.float32)

    logp = jax.nn.log_softmax(logits.astype(jnp.float32), axis=-1)
    xent = -jnp.mean(jnp.sum(onehot * logp, axis=-1))

    def sum_xent_of_imgs(im):
        xf = im.reshape(n, -1)
        pred = xf @ w + b
        lp = jax.nn.log_softmax(pred, axis=-1)
        return -jnp.sum(onehot * lp)

    g = jax.grad(sum_xent_of_imgs)(imgs.astype(jnp.float32))
    gp = jnp.sum(g ** 2) / n
    return xent + gradl2_weight * gp


if __name__ == "__main__":
    key = jax.random.PRNGKey(0)
    NUM_CLASSES = 16
    GRADL2_WEIGHT = 0.1

    def run_check(n, c, h, wsp, tile_d):
        d = c * h * wsp
        ki, kl, kt, kw, kb = jax.random.split(jax.random.fold_in(key, n), 5)
        imgs = jax.random.normal(ki, (n, c, h, wsp), dtype=jnp.float32)    # NCHW
        logits = jax.random.normal(kl, (n, NUM_CLASSES), dtype=jnp.float32)
        target = jax.random.randint(kt, (n,), 0, NUM_CLASSES, dtype=jnp.int32)
        # deterministic synthetic linear-model parameters (model = flatten -> Linear)
        w_param = 0.02 * jax.random.normal(kw, (d, NUM_CLASSES), dtype=jnp.float32)
        b_param = 0.01 * jax.random.normal(kb, (NUM_CLASSES,), dtype=jnp.float32)

        loss = jax.block_until_ready(xent_avg_gradl2_loss(
            logits, imgs, target, w_param, b_param, GRADL2_WEIGHT,
            training=True, tile_d=tile_d))
        ref = jax.block_until_ready(_reference(
            logits, imgs, target, w_param, b_param, GRADL2_WEIGHT))
        assert jnp.allclose(loss, ref, rtol=1e-2, atol=1e-4), (n, tile_d, loss, ref)

    # batch=2, D=1024, tile_d=384: multi-tile ragged D reduction + resident-W path.
    run_check(2, 4, 16, 16, tile_d=384)
    # batch=2, default-style single D tile: streamed (whole) W path.
    run_check(2, 4, 16, 16, tile_d=16384)
    # batch=32: >= 2 N tiles so the "parallel" axis spans both TCs on v7x.
    run_check(32, 4, 16, 16, tile_d=384)

    print("KERNEL_OK")
</pallas_src>

<mosaic_0001>
module attributes {stable_mosaic.version = 11 : i64} {
  func.func @_fused_loss_kernel(%arg0: i32, %arg1: i32, %arg2: memref<2x1xi32, #tpu.memory_space<vmem>>, %arg3: memref<2x16xf32, #tpu.memory_space<vmem>>, %arg4: memref<2x384xf32, #tpu.memory_space<vmem>>, %arg5: memref<1152x16xbf16, #tpu.memory_space<vmem>>, %arg6: memref<1x16xf32, #tpu.memory_space<vmem>>, %arg7: memref<16x16xf32, #tpu.memory_space<vmem>>, %arg8: memref<1x8x128xf32, #tpu.memory_space<vmem>>, %arg9: memref<1x8x128xf32, #tpu.memory_space<vmem>>, %arg10: memref<2x16xf32, #tpu.memory_space<vmem>>) attributes {dimension_semantics = [#tpu.dimension_semantics<parallel>, #tpu.dimension_semantics<arbitrary>], iteration_bounds = array<i64: 1, 3>, scalar_prefetch = 0 : i64, scratch_operands = 1 : i64, tpu.core_type = #tpu.core_type<tc>, window_params = [{transform_indices = @transform_0, window_bounds = array<i64: 2, 1>}, {transform_indices = @transform_1, window_bounds = array<i64: 2, 16>}, {transform_indices = @transform_2, window_bounds = array<i64: 2, 384>}, {pipeline_mode = #tpu.pipeline_mode<synchronous>, transform_indices = @transform_3, window_bounds = array<i64: 1152, 16>}, {pipeline_mode = #tpu.pipeline_mode<synchronous>, transform_indices = @transform_4, window_bounds = array<i64: 1, 16>}, {pipeline_mode = #tpu.pipeline_mode<synchronous>, transform_indices = @transform_5, window_bounds = array<i64: 16, 16>}, {transform_indices = @transform_6, window_bounds = array<i64: 1, 8, 128>}, {transform_indices = @transform_7, window_bounds = array<i64: 1, 8, 128>}]} {
    %c0_i32 = arith.constant 0 : i32
    %0 = arith.cmpi eq, %arg1, %c0_i32 : i32
    %1 = arith.extui %0 : i1 to i32
    %c0_i32_0 = arith.constant 0 : i32
    %2 = arith.cmpi ne, %1, %c0_i32_0 : i32
    scf.if %2 {
      %cst_11 = arith.constant 0.000000e+00 : f32
      %25 = vector.broadcast %cst_11 : f32 to vector<2x16xf32>
      %c0_12 = arith.constant 0 : index
      %c0_13 = arith.constant 0 : index
      %26 = vector.load %arg10[%c0_12, %c0_13] : memref<2x16xf32, #tpu.memory_space<vmem>>, vector<2x16xf32>
      tpu.vector_store %arg10[%c0_12, %c0_13], %25 {strides = array<i32>} : memref<2x16xf32, #tpu.memory_space<vmem>>, vector<2x16xf32>,
    } else {
    }
    %c0 = arith.constant 0 : index
    %c0_1 = arith.constant 0 : index
    %3 = vector.load %arg4[%c0, %c0_1] : memref<2x384xf32, #tpu.memory_space<vmem>>, vector<2x384xf32>
    %4 = tpu.iota {dimensions = array<i32: 1>} : vector<2x384xi32>
    %c384_i32 = arith.constant 384 : i32
    %5 = arith.muli %arg1, %c384_i32 : i32
    %c1024_i32 = arith.constant 1024 : i32
    %6 = arith.subi %c1024_i32, %5 : i32
    %c384_i32_2 = arith.constant 384 : i32
    %7 = arith.minsi %6, %c384_i32_2 : i32
    %8 = vector.broadcast %7 : i32 to vector<2x384xi32>
    %9 = arith.cmpi slt, %4, %8 : vector<2x384xi32>
    %c0_i32_3 = arith.constant 0 : i32
    %10 = arith.sitofp %c0_i32_3 : i32 to f32
    %11 = vector.broadcast %10 : f32 to vector<2x384xf32>
    %12 = arith.select %9, %3, %11 : vector<2x384xi1>, vector<2x384xf32>
    %13 = arith.truncf %12 : vector<2x384xf32> to vector<2x384xbf16>
    %c384_i32_4 = arith.constant 384 : i32
    %14 = arith.muli %arg1, %c384_i32_4 : i32
    %15 = tpu.assume_multiple %14, 128 : i32
    %16 = arith.index_cast %15 : i32 to index
    %c0_5 = arith.constant 0 : index
    %17 = vector.load %arg5[%16, %c0_5] : memref<1152x16xbf16, #tpu.memory_space<vmem>>, vector<384x16xbf16>
    %c0_6 = arith.constant 0 : index
    %c0_7 = arith.constant 0 : index
    %18 = vector.load %arg10[%c0_6, %c0_7] : memref<2x16xf32, #tpu.memory_space<vmem>>, vector<2x16xf32>
    %cst = arith.constant dense<0.000000e+00> : vector<2x16xf32>
    %19 = tpu.matmul %13, %17, %cst {dimension_numbers = #tpu.dot_dimension_numbers<[1], [0], [0], [1], [0, 0, 1, 1], [], []>} : vector<2x384xbf16>, vector<384x16xbf16>, vector<2x16xf32> -> vector<2x16xf32>
    %20 = arith.addf %18, %19 : vector<2x16xf32>
    %c0_8 = arith.constant 0 : index
    %c0_9 = arith.constant 0 : index
    %21 = vector.load %arg10[%c0_8, %c0_9] : memref<2x16xf32, #tpu.memory_space<vmem>>, vector<2x16xf32>
    tpu.vector_store %arg10[%c0_8, %c0_9], %20 {strides = array<i32>} : memref<2x16xf32, #tpu.memory_space<vmem>>, vector<2x16xf32>,
    %c2_i32 = arith.constant 2 : i32
    %22 = arith.cmpi eq, %arg1, %c2_i32 : i32
    %23 = arith.extui %22 : i1 to i32
    %c0_i32_10 = arith.constant 0 : i32
    %24 = arith.cmpi ne, %23, %c0_i32_10 : i32
    scf.if %24 {
      %c0_11 = arith.constant 0 : index
      %c0_12 = arith.constant 0 : index
      %25 = vector.load %arg2[%c0_11, %c0_12] : memref<2x1xi32, #tpu.memory_space<vmem>>, vector<2x1xi32>
      %26 = tpu.iota {dimensions = array<i32: 1>} : vector<2x16xi32>
      %27 = vector.broadcast %25 : vector<2x1xi32> to vector<2x16xi32>
      %28 = arith.cmpi eq, %26, %27 : vector<2x16xi32>
      %29 = arith.extui %28 : vector<2x16xi1> to vector<2x16xi32>
      %30 = arith.sitofp %29 : vector<2x16xi32> to vector<2x16xf32>
      %c0_13 = arith.constant 0 : index
      %c0_14 = arith.constant 0 : index
      %31 = vector.load %arg3[%c0_13, %c0_14] : memref<2x16xf32, #tpu.memory_space<vmem>>, vector<2x16xf32>
      %cst_15 = arith.constant dense<0xFF800000> : vector<2xf32>
      %32 = vector.multi_reduction <maximumf>, %31, %cst_15 [1] : vector<2x16xf32> to vector<2xf32>
      %33 = vector.shape_cast %32 : vector<2xf32> to vector<2x1xf32>
      %34 = vector.broadcast %33 : vector<2x1xf32> to vector<2x16xf32>
      %35 = arith.subf %31, %34 : vector<2x16xf32>
      %36 = math.exp %35 : vector<2x16xf32>
      %cst_16 = arith.constant dense<0.000000e+00> : vector<2xf32>
      %37 = vector.multi_reduction <add>, %36, %cst_16 [1] : vector<2x16xf32> to vector<2xf32>
      %38 = vector.shape_cast %37 : vector<2xf32> to vector<2x1xf32>
      %39 = math.log %38 : vector<2x1xf32>
      %40 = arith.addf %33, %39 : vector<2x1xf32>
      %41 = arith.mulf %30, %31 : vector<2x16xf32>
      %cst_17 = arith.constant dense<0.000000e+00> : vector<2xf32>
      %42 = vector.multi_reduction <add>, %41, %cst_17 [1] : vector<2x16xf32> to vector<2xf32>
      %43 = vector.shape_cast %42 : vector<2xf32> to vector<2x1xf32>
      %44 = arith.subf %40, %43 : vector<2x1xf32>
      %45 = vector.shape_cast %44 : vector<2x1xf32> to vector<1x2x1xf32>
      %cst_18 = arith.constant dense<0.000000e+00> : vector<1xf32>
      %46 = vector.multi_reduction <add>, %45, %cst_18 [1, 2] : vector<1x2x1xf32> to vector<1xf32>
      %47 = vector.shape_cast %46 : vector<1xf32> to vector<1x1x1xf32>
      %48 = vector.extract %47[0, 0, 0] : f32 from vector<1x1x1xf32>
      %c0_19 = arith.constant 0 : index
      %c0_20 = arith.constant 0 : index
      %49 = vector.load %arg10[%c0_19, %c0_20] : memref<2x16xf32, #tpu.memory_space<vmem>>, vector<2x16xf32>
      %c0_21 = arith.constant 0 : index
      %c0_22 = arith.constant 0 : index
      %50 = vector.load %arg6[%c0_21, %c0_22] : memref<1x16xf32, #tpu.memory_space<vmem>>, vector<1x16xf32>
      %51 = vector.broadcast %50 : vector<1x16xf32> to vector<2x16xf32>
      %52 = arith.addf %49, %51 : vector<2x16xf32>
      %cst_23 = arith.constant dense<0xFF800000> : vector<2xf32>
      %53 = vector.multi_reduction <maximumf>, %52, %cst_23 [1] : vector<2x16xf32> to vector<2xf32>
      %54 = vector.shape_cast %53 : vector<2xf32> to vector<2x1xf32>
      %55 = vector.broadcast %54 : vector<2x1xf32> to vector<2x16xf32>
      %56 = arith.subf %52, %55 : vector<2x16xf32>
      %57 = math.exp %56 : vector<2x16xf32>
      %cst_24 = arith.constant dense<0.000000e+00> : vector<2xf32>
      %58 = vector.multi_reduction <add>, %57, %cst_24 [1] : vector<2x16xf32> to vector<2xf32>
      %59 = vector.shape_cast %58 : vector<2xf32> to vector<2x1xf32>
      %60 = vector.broadcast %59 : vector<2x1xf32> to vector<2x16xf32>
      %61 = arith.divf %57, %60 : vector<2x16xf32>
      %62 = arith.subf %61, %30 : vector<2x16xf32>
      %c0_25 = arith.constant 0 : index
      %c0_26 = arith.constant 0 : index
      %63 = vector.load %arg7[%c0_25, %c0_26] : memref<16x16xf32, #tpu.memory_space<vmem>>, vector<16x16xf32>
      %cst_27 = arith.constant dense<0.000000e+00> : vector<2x16xf32>
      %64 = tpu.matmul %62, %63, %cst_27 {dimension_numbers = #tpu.dot_dimension_numbers<[1], [0], [0], [1], [0, 0, 1, 1], [], []>} : vector<2x16xf32>, vector<16x16xf32>, vector<2x16xf32> -> vector<2x16xf32>
      %65 = arith.mulf %64, %62 : vector<2x16xf32>
      %66 = vector.shape_cast %65 : vector<2x16xf32> to vector<1x2x16xf32>
      %cst_28 = arith.constant dense<0.000000e+00> : vector<1xf32>
      %67 = vector.multi_reduction <add>, %66, %cst_28 [1, 2] : vector<1x2x16xf32> to vector<1xf32>
      %68 = vector.shape_cast %67 : vector<1xf32> to vector<1x1x1xf32>
      %69 = vector.extract %68[0, 0, 0] : f32 from vector<1x1x1xf32>
      %cst_29 = arith.constant 0.000000e+00 : f32
      %70 = vector.broadcast %cst_29 : f32 to vector<1x8x128xf32>
      %71 = vector.broadcast %48 : f32 to vector<1x8x128xf32>
      %72 = arith.addf %70, %71 : vector<1x8x128xf32>
      %c0_30 = arith.constant 0 : index
      %c0_31 = arith.constant 0 : index
      %c0_32 = arith.constant 0 : index
      %73 = vector.load %arg8[%c0_30, %c0_31, %c0_32] : memref<1x8x128xf32, #tpu.memory_space<vmem>>, vector<1x8x128xf32>
      tpu.vector_store %arg8[%c0_30, %c0_31, %c0_32], %72 {strides = array<i32>} : memref<1x8x128xf32, #tpu.memory_space<vmem>>, vector<1x8x128xf32>,
      %cst_33 = arith.constant 0.000000e+00 : f32
      %74 = vector.broadcast %cst_33 : f32 to vector<1x8x128xf32>
      %75 = vector.broadcast %69 : f32 to vector<1x8x128xf32>
      %76 = arith.addf %74, %75 : vector<1x8x128xf32>
      %c0_34 = arith.constant 0 : index
      %c0_35 = arith.constant 0 : index
      %c0_36 = arith.constant 0 : index
      %77 = vector.load %arg9[%c0_34, %c0_35, %c0_36] : memref<1x8x128xf32, #tpu.memory_space<vmem>>, vector<1x8x128xf32>
      tpu.vector_store %arg9[%c0_34, %c0_35, %c0_36], %76 {strides = array<i32>} : memref<1x8x128xf32, #tpu.memory_space<vmem>>, vector<1x8x128xf32>,
    } else {
    }
    return
  }
  func.func @transform_0(%arg0: i32, %arg1: i32) -> (i32, i32) {
    %c0_i32 = arith.constant 0 : i32
    %c0_i32_0 = arith.constant 0 : i32
    return %arg0, %c0_i32 : i32, i32
  }
  func.func @transform_1(%arg0: i32, %arg1: i32) -> (i32, i32) {
    %c0_i32 = arith.constant 0 : i32
    %c0_i32_0 = arith.constant 0 : i32
    return %arg0, %c0_i32 : i32, i32
  }
  func.func @transform_2(%arg0: i32, %arg1: i32) -> (i32, i32) {
    %c0_i32 = arith.constant 0 : i32
    return %arg0, %arg1 : i32, i32
  }
  func.func @transform_3(%arg0: i32, %arg1: i32) -> (i32, i32) {
    %c0_i32 = arith.constant 0 : i32
    %c0_i32_0 = arith.constant 0 : i32
    %c0_i32_1 = arith.constant 0 : i32
    return %c0_i32, %c0_i32_0 : i32, i32
  }
  func.func @transform_4(%arg0: i32, %arg1: i32) -> (i32, i32) {
    %c0_i32 = arith.constant 0 : i32
    %c0_i32_0 = arith.constant 0 : i32
    %c0_i32_1 = arith.constant 0 : i32
    return %c0_i32, %c0_i32_0 : i32, i32
  }
  func.func @transform_5(%arg0: i32, %arg1: i32) -> (i32, i32) {
    %c0_i32 = arith.constant 0 : i32
    %c0_i32_0 = arith.constant 0 : i32
    %c0_i32_1 = arith.constant 0 : i32
    return %c0_i32, %c0_i32_0 : i32, i32
  }
  func.func @transform_6(%arg0: i32, %arg1: i32) -> (i32, i32, i32) {
    %c0_i32 = arith.constant 0 : i32
    %c0_i32_0 = arith.constant 0 : i32
    %c0_i32_1 = arith.constant 0 : i32
    return %arg0, %c0_i32, %c0_i32_0 : i32, i32, i32
  }
  func.func @transform_7(%arg0: i32, %arg1: i32) -> (i32, i32, i32) {
    %c0_i32 = arith.constant 0 : i32
    %c0_i32_0 = arith.constant 0 : i32
    %c0_i32_1 = arith.constant 0 : i32
    return %arg0, %c0_i32, %c0_i32_0 : i32, i32, i32
  }
}

</mosaic_0001>

<bundles_post_ra>
// kernel: tpu_custom_call.1
= control target key start
LH: loop header
LB: loop body
LE: loop exit
PB: predicated region body
PF: predicated region fallthrough
CT: control target
= control target key end

     0   :  { %13 = vsyncpa [#allocation4], 0  ;;  %s1419_s0 = inlined_call_operand.vmem [shape: s32[2,1], index: 0, kind: input, shape index: {}]   ;;  %s1420_s1 = inlined_call_operand.vmem [shape: f32[2,16], index: 1, kind: input, shape index: {}]   ;;  %s1421_s2 = inlined_call_operand.vmem [shape: f32[2,1024], index: 2, kind: input, shape index: {}]   ;;  %s1422_s3 = inlined_call_operand.vmem [shape: bf16[1152,16], index: 3, kind: input, shape index: {}]   ;;  %s1423_s4 = inlined_call_operand.vmem [shape: f32[1,16], index: 4, kind: input, shape index: {}]   ;;  %s1424_s5 = inlined_call_operand.vmem [shape: f32[16,16], index: 5, kind: input, shape index: {}]   ;;  %s1425_s6 = inlined_call_operand.hbm [shape: f32[1,8,128], index: 6, kind: output, shape index: {0}]   ;;  %s1426_s7 = inlined_call_operand.hbm [shape: f32[1,8,128], index: 7, kind: output, shape index: {1}]  }
   0x1   :  { %14 = vsyncpa [#allocation6], 0  ;;  %s1285_s24 = smov 0   ;;  %s1287_s25 = smov 0  }
   0x2   :  { %s1289_s26 = smov 0  }
   0x3 LB: > { %s959_s27 = sadd.s32 4294967295, %s1234_s26   ;;  %s29_s28 = sadd.s32 1, %s1230_s25  ;;  %s1234_s26 = sphi %s1289_s26, %s20_s26   ;;  %s1230_s25 = sphi %s1287_s25, %s1429_s25   ;;  %s1226_s24 = sphi %s1285_s24, %s1428_s24  }
   0x4   : > { %p30_p0 = scmp.ge.s32.totalorder %s29_s28, 3  ;;  %p964_p1 = scmp.ge.s32.totalorder %s1234_s26, 1 }
   0x5   : > { %p287_p2 = scmp.lt.s32.totalorder %s1234_s26, 4 }
   0x6   : > { %s1431_s28 = smov (%p30_p0, %s29_s28), 0 }
   0x7   : > { %p288_p3 = pnand %p964_p1, %p287_p2 }
   0x8   : > { %s338_s29 = smul.u32 (!%p288_p3), 3, %s1226_s24  ;;  %p966_p5 = scmp.ne.s32.totalorder (!%p288_p3), %s1226_s24, 0 }
   0x9   : > { %291 = sbr.rel (%p288_p3) target bundleno = 1011 (0x3f3), region = 44 }
   0xa   : > { %p345_p4 = scmp.lt.s32.totalorder (!%p288_p3), %s338_s29, 7 }
   0xe   : > { %s1433_s29 = smov (!%p345_p4, %s338_s29), 7  ;;  %360 = sbr.rel (%p966_p5) target bundleno = 21 (0x15), region = 48 }
   0xf   : > { %s965_s30 = sshll.u32 %s1433_s29, 1 }
  0x10   : > { %s1310_s10 = scalar_lea.vmem %s1421_s2, %s965_s30 }
  0x13   : > { %vm361_vm0 = vcmask 123904   ;;  %v1236_v0 = vmov 0.0  }
  0x14   : > { %362 = vst.msk [vmem:[#allocation2] sm:$0x3] %vm361_vm0, %v1236_v0 }
  0x15 PF: > { %s368_s11 = smul.u32 384, %s1226_s24  ;;  %v1237_v1 = vmov 0.0   ;;  %vm1238_vm1 = vmmov 0   ;;  %v364_v4 = vlaneseq  ;;  %v1239_v5 = vmov 1983009808   ;;  %p1001_p7 = scmp.ne.s32.totalorder %s1226_s24, 2 }
  0x16   : > { %1045 = vmatprep.subr.bf16.mxu1 %v1237_v1  ;;  %1061 = vmatprep.mubr.msk.bf16.mxu1 %vm1238_vm1, %v1237_v1  ;;  %v379_v6 = vunpack.c.l.s4 %v1239_v5  ;;  %v363_v16 = vld [vmem:[%s1310_s10] sm:$0x3f]  ;;  %vm680_vm8 = vcmask 123904  }
  0x17   : > { %s402_s12 = sshra.s32 %s368_s11, 3  ;;  %v382_v12 = vshrl.u32 %v364_v4, 7  ;;  %s369_s17 = ssub.s32 1024, %s368_s11  ;;  %v1338_v22 = vand.u32 127, %v364_v4  ;;  %v377_v34 = vcombine.high %v363_v16, %v363_v16 }
  0x18   : > { %s967_s13 = sshll.u32 %s402_s12, 2  ;;  %v380_v11 = vunpack.c.0.s8 %v379_v6  ;;  %p370_p6 = scmp.lt.s32.totalorder %s369_s17, 384 }
  0x19   : > { %s1319_s16 = scalar_lea.vmem %s1422_s3, %s967_s13  ;;  %v366_v27 = vadd.s32 128, %v1338_v22  ;;  %v367_v37 = vadd.s32 256, %v1338_v22 }
  0x1a   : > { %v1121_v2 = vld [vmem:[%s1319_s16 + $0x78] sm:$0xff]   ;;  %v1124_v8 = vld [vmem:[%s1319_s16 + $0x70] sm:$0xff]   ;;  %v1127_v13 = vld [vmem:[%s1319_s16 + $0x68] sm:$0xff]   ;;  %v383_v18 = vsub.s32 %v380_v11, %v382_v12  ;;  %s1435_s17 = smov (!%p370_p6, %s369_s17), 384 }
  0x1b   : > { %v1122_v3 = vld [vmem:[%s1319_s16 + $0xb8] sm:$0xff]   ;;  %1011 = vmatprep.subr.bf16.mxu0 %v1121_v2  ;;  %v1125_v9 = vld [vmem:[%s1319_s16 + $0xb0] sm:$0xff]   ;;  %v1128_v14 = vld [vmem:[%s1319_s16 + $0xa8] sm:$0xff]   ;;  %v372_v29 = vstv %s1435_s17 }
  0x1c   : > { %v1123_v7 = vld [vmem:[%s1319_s16 + $0x38] sm:$0xff]   ;;  %1046 = vmatpush3.bf16.msra.mxu1 %v1122_v3  ;;  %v1126_v10 = vld [vmem:[%s1319_s16 + $0x30] sm:$0xff]   ;;  %v1129_v15 = vld [vmem:[%s1319_s16 + $0x28] sm:$0xff]   ;;  %v384_v23 = vrot.slane %v363_v16, %v383_v18  ;;  %vm374_vm2 = vcmp.lt.s32.totalorder %v366_v27, %v372_v29  ;;  %v391_v39 = vrot.slane %v377_v34, %v383_v18  ;;  %vm375_vm4 = vcmp.lt.s32.totalorder %v367_v37, %v372_v29 }
  0x1d   : > { %1012 = vmatpush3.bf16.msra.mxu0 %v1123_v7  ;;  %1047 = vmatprep.subr.bf16.mxu1 %v1237_v1  ;;  %v1130_v17 = vld [vmem:[%s1319_s16 + $0x60] sm:$0xff]   ;;  %v1133_v21 = vld [vmem:[%s1319_s16 + $0x58] sm:$0xff]   ;;  %v1136_v26 = vld [vmem:[%s1319_s16 + $0x50] sm:$0xff]   ;;  %vm373_vm5 = vcmp.lt.s32.totalorder %v1338_v22, %v372_v29 }
  0x1e   : > { %1013 = vmatprep.subr.bf16.mxu0 %v1124_v8  ;;  %v1131_v19 = vld [vmem:[%s1319_s16 + $0xa0] sm:$0xff]   ;;  %v1134_v24 = vld [vmem:[%s1319_s16 + $0x98] sm:$0xff]   ;;  %v392_v28 = vcombine.high %v384_v23, %v384_v23  ;;  %v1137_v30 = vld [vmem:[%s1319_s16 + $0x90] sm:$0xff]   ;;  %v999_v42 = vpack.c.bf16 %v391_v39, %v391_v39  ;;  %v996_v43 = vpack.c.bf16 %v384_v23, %v384_v23 }
  0x1f   : > { %v1132_v20 = vld [vmem:[%s1319_s16 + $0x20] sm:$0xff]   ;;  %v1135_v25 = vld [vmem:[%s1319_s16 + $0x18] sm:$0xff]   ;;  %v1138_v31 = vld [vmem:[%s1319_s16 + $0x10] sm:$0xff]  }
  0x20   : > { %1048 = vmatpush3.bf16.msra.mxu1 %v1125_v9  ;;  %v1139_v32 = vld [vmem:[%s1319_s16 + $0x48] sm:$0xff]   ;;  %v993_v33 = vpack.c.bf16 %v392_v28, %v392_v28  ;;  %vm992_vm3 = vmpackc.low %vm374_vm2, %vm374_vm2  ;;  %v1142_v38 = vld [vmem:[%s1319_s16 + $0x40] sm:$0xff]  }
  0x21   : > { %1014 = vmatpush3.bf16.msra.mxu0 %v1126_v10  ;;  %1049 = vmatprep.subr.bf16.mxu1 %v1237_v1  ;;  %v1140_v35 = vld [vmem:[%s1319_s16 + $0x88] sm:$0xff]   ;;  %v1143_v40 = vld [vmem:[%s1319_s16 + $0x80] sm:$0xff]   ;;  %vm998_vm6 = vmpackc.low %vm375_vm4, %vm375_vm4 }
  0x22   : > { %1015 = vmatprep.subr.bf16.mxu0 %v1127_v13  ;;  %v1141_v36 = vld [vmem:[%s1319_s16 + $0x8] sm:$0xff]   ;;  %994 = vmatprep.mubr.msk.bf16.mxu0 %vm992_vm3, %v993_v33  ;;  %v1144_v41 = vld [vmem:[%s1319_s16] sm:$0xff]   ;;  %vm995_vm7 = vmpackc.low %vm373_vm5, %vm373_vm5 }
  0x23   : > { %v454_v50 = vld [vmem:[#allocation2] sm:$0x3] }
  0x24   : > { %1050 = vmatpush3.bf16.msra.mxu1 %v1128_v14 }
  0x25   : > { %1016 = vmatpush3.bf16.msra.mxu0 %v1129_v15  ;;  %1051 = vmatprep.subr.bf16.mxu1 %v1237_v1 }
  0x26   : > { %1017 = vmatprep.subr.bf16.mxu0 %v1130_v17 }
  0x28   : > { %1052 = vmatpush3.bf16.msra.mxu1 %v1131_v19 }
  0x29   : > { %1018 = vmatpush3.bf16.msra.mxu0 %v1132_v20  ;;  %1053 = vmatprep.subr.bf16.mxu1 %v1237_v1 }
  0x2a   : > { %1019 = vmatprep.subr.bf16.mxu0 %v1133_v21 }
  0x2c   : > { %1054 = vmatpush3.bf16.msra.mxu1 %v1134_v24 }
  0x2d   : > { %1020 = vmatpush3.bf16.msra.mxu0 %v1135_v25  ;;  %1055 = vmatprep.subr.bf16.mxu1 %v1237_v1 }
  0x2e   : > { %1021 = vmatprep.subr.bf16.mxu0 %v1136_v26 }
  0x30   : > { %1056 = vmatpush3.bf16.msra.mxu1 %v1137_v30 }
  0x31   : > { %1022 = vmatpush3.bf16.msra.mxu0 %v1138_v31  ;;  %1057 = vmatprep.subr.bf16.mxu1 %v1237_v1 }
  0x32   : > { %1023 = vmatprep.subr.bf16.mxu0 %v1139_v32 }
  0x34   : > { %1058 = vmatpush3.bf16.msra.mxu1 %v1140_v35 }
  0x35   : > { %1024 = vmatpush3.bf16.msra.mxu0 %v1141_v36  ;;  %1059 = vmatprep.subr.bf16.mxu1 %v1237_v1 }
  0x36   : > { %1025 = vmatprep.subr.bf16.mxu0 %v1142_v38 }
  0x38   : > { %1060 = vmatpush3.bf16.msra.mxu1 %v1143_v40 }
  0x39   : > { %1026 = vmatpush3.bf16.msra.mxu0 %v1144_v41 }
  0x3b   : > { %1062 = vmatmul.mubr.msk.bf16.vlgmr.msra.gmra.mxu1 %vm998_vm6, %v999_v42 }
  0x3c   : > { %997 = vmatmul.mubr.msk.bf16.vlgmr.msra.gmra.mxu0 %vm995_vm7, %v996_v43 }
  0xfb   : > { %v673_v44 = vpop.f32.mrf.mxu1 }
  0xfc   : > { %v1027_v45 = vpop.f32.mrf.mxu0 }
  0xfd   : > { %v1063_v46 = vpop.f32.mrf.mxu1 }
  0xfe   : > { %v1028_v47 = vpop.f32.mrf.mxu0 }
  0xff   : > { %v1029_v48 = vadd.f32 %v1028_v47, %v1027_v45  ;;  %v676_v49 = vpop.f32.mrf.mxu1 }
 0x100   : > { %v1030_v51 = vpop.f32.mrf.mxu0 }
 0x101   : > { %v674_v52 = vadd.f32 %v1029_v48, %v673_v44  ;;  %v1064_v53 = vpop.f32.mrf.mxu1  ;;  %685 = sbr.rel (%p1001_p7) target bundleno = 983 (0x3d7), region = 52 }
 0x102   : > { %v1031_v54 = vpop.f32.mrf.mxu0 }
 0x103   : > { %v679_v55 = vadd.f32 %v674_v52, %v454_v50 }
 0x105   : > { %681 = vst.msk [vmem:[#allocation2] sm:$0x3] %vm680_vm8, %v679_v55 }
 0x106   : > { %v686_v56 = vld [vmem:[%s1419_s0] sm:$0x3]  ;;  %v1240_v58 = vmov 0   ;;  %v1241_v0 = vmov 0.0   ;;  %v744_v7 = vld [vmem:[%s1424_s5 + $0x8] sm:$0xff]  ;;  %vm1242_vm9 = vmmov 0  }
 0x107   : > { %1146 = vset.pattern.permute.xlu1 %v1240_v58  ;;  %v1003_v59 = vld [vmem:[%s1423_s4] ss:$0 sm:$0xff]  ;;  %1147 = vset.pattern.permute.xlu0 %v1240_v58  ;;  %vm745_vm11 = vcmask 130048   ;;  %vm711_vm12 = vcmask 1024  }
 0x108   : > { %688 = vperm.xlu1 %1146, %v686_v56   ;;  %v693_v62 = vld [vmem:[%s1420_s1] sm:$0x3]  ;;  %1065 = vmatprep.subr.mxu0 %v1241_v0 }
 0x109   : > { %v694_v63 = vsel %vm680_vm8, %v693_v62, -inf  ;;  %v743_v8 = vld [vmem:[%s1424_s5] sm:$0xff]  ;;  %1066 = vmatpush3.msra.mxu0 %v744_v7  ;;  %1069 = vmatprep.mubr.msk.f32.mxu0 %vm1242_vm9, %v1241_v0 }
 0x10a   : > { %1067 = vmatprep.subr.mxu0 %v1241_v0 }
 0x10b   : > { %1068 = vmatpush3.msra.mxu0 %v743_v8 }
 0x10c   : > { %v722_v57 = vld [vmem:[#allocation2] sm:$0x3] }
 0x10d   : > { %v730_v60 = vadd.f32 %v1003_v59, %v722_v57 }
 0x10f   : > { %v731_v61 = vsel %vm680_vm8, %v730_v60, -inf }
 0x110   : > { %732 = vmax.xlane.f32.xlu0 %v731_v61 }
 0x12c   : > { %695 = vmax.xlane.f32.xlu1 %v694_v63 }
 0x183   : > { %v689_v6 = vpop.permute.xlu1 %688 }
 0x184   : > { %vm690_vm10 = vcmp.eq.s32.totalorder %v1338_v22, %v689_v6 }
 0x185   : > { %v1002_v12 = vsel %vm690_vm10, 1.0, %v1241_v0 }
 0x186   : > { %v706_v13 = vmul.f32 %v1002_v12, %v693_v62 }
 0x188   : > { %v707_v16 = vsel %vm680_vm8, %v706_v13, 0.0 }
 0x199   : > { %v733_v1 = vpop.xlane.xlu0 %732 }
 0x19a   : > { %v734_v2 = vsub.f32 %v730_v60, %v733_v1 }
 0x19c   : > { %v735_v3 = vmul.f32 1.442695, %v734_v2 }
 0x19e   : > { %1148 = vpow2.f32 %v735_v3 }
 0x1ab   : > { %v1149_v4 = vpop.eup %1148 }
 0x1ac   : > { %v737_v5 = vsel %vm680_vm8, %v1149_v4, 0.0 }
 0x1ad   : > { %738 = vadd.xlane.f32.xlu0 %v737_v5 }
 0x1b5   : > { %v696_v9 = vpop.xlane.xlu1 %695 }
 0x1b6   : > { %v697_v10 = vsub.f32 %v693_v62, %v696_v9 }
 0x1b8   : > { %v698_v11 = vmul.f32 1.442695, %v697_v10 }
 0x1ba   : > { %1150 = vpow2.f32 %v698_v11 }
 0x1c7   : > { %v1151_v14 = vpop.eup %1150 }
 0x1c8   : > { %v700_v15 = vsel %vm680_vm8, %v1151_v14, 0.0 }
 0x1c9   : > { %701 = vadd.xlane.f32.xlu0 %v700_v15 }
 0x1cd   : > { %708 = vadd.xlane.f32.xlu0 %v707_v16 }
 0x236   : > { %v739_v17 = vpop.xlane.xlu0 %738 }
 0x237   : > { %1152 = vrcp.f32 %v739_v17 }
 0x244   : > { %v1153_v18 = vpop.eup %1152 }
 0x245   : > { %v741_v19 = vmul.f32 %v1153_v18, %v1149_v4 }
 0x247   : > { %v742_v20 = vsub.f32 %v741_v19, %v1002_v12 }
 0x249   : > { %1070 = vmatmul.mubr.msk.f32.vlgmr.msra.gmra.mxu0 %vm745_vm11, %v742_v20 }
 0x252   : > { %v702_v21 = vpop.xlane.xlu0 %701 }
 0x253   : > { %1154 = vlog2.f32 %v702_v21 }
 0x256   : > { %v709_v24 = vpop.xlane.xlu0 %708 }
 0x260   : > { %v1155_v23 = vpop.eup %1154 }
 0x261   : > { %v704_v22 = vmul.f32 0.6931472, %v1155_v23 }
 0x263   : > { %v705_v25 = vadd.f32 %v704_v22, %v696_v9 }
 0x265   : > { %v710_v26 = vsub.f32 %v705_v25, %v709_v24 }
 0x267   : > { %v712_v27 = vsel %vm711_vm12, %v710_v26, 0.0 }
 0x268   : > { %713 = vadd.xlane.f32.xlu0 %v712_v27 }
 0x2f1   : > { %v714_v28 = vpop.xlane.xlu0 %713 }
 0x2f2   : > { %v715_v29 = vrot.slane %v714_v28, 4 }
 0x2f4   : > { %v716_v30 = vadd.f32 %v715_v29, %v714_v28 }
 0x2f6   : > { %v717_v31 = vrot.slane %v716_v30, 2 }
 0x2f8   : > { %v718_v32 = vadd.f32 %v717_v31, %v716_v30 }
 0x2fa   : > { %v719_v33 = vrot.slane %v718_v32, 1 }
 0x2fc   : > { %v720_v34 = vadd.f32 %v719_v33, %v718_v32 }
 0x2fe   : > { %1072 = vpush %v720_v34 }
 0x309   : > { %v815_v35 = vpop.f32.mrf.mxu0 }
 0x30a   : > { %v819_v36 = vmul.f32 %v815_v35, %v742_v20 }
 0x30b   : > { %v1071_v37 = vpop.f32.mrf.mxu0 }
 0x30c   : > { %v820_v38 = vsel %vm680_vm8, %v819_v36, 0.0 }
 0x30d   : > { %821 = vadd.xlane.f32.xlu0 %v820_v38 }
 0x32f   : > { %s1073_s9 = spop %1072 }
 0x330   : > { %v830_v39 = vstv %s1073_s9 }
 0x331   : > { %832 = vst [vmem:[#allocation3] sm:$0xff] %v830_v39 }
 0x396   : > { %v822_v40 = vpop.xlane.xlu0 %821 }
 0x397   : > { %v823_v41 = vrot.slane %v822_v40, 4 }
 0x399   : > { %v824_v42 = vadd.f32 %v823_v41, %v822_v40 }
 0x39b   : > { %v825_v43 = vrot.slane %v824_v42, 2 }
 0x39d   : > { %v826_v44 = vadd.f32 %v825_v43, %v824_v42 }
 0x39f   : > { %v827_v45 = vrot.slane %v826_v44, 1 }
 0x3a1   : > { %v828_v46 = vadd.f32 %v827_v45, %v826_v44 }
 0x3a3   : > { %1074 = vpush %v828_v46 }
 0x3d4   : > { %s1075_s10 = spop %1074 }
 0x3d5   : > { %v833_v47 = vstv %s1075_s10 }
 0x3d6   : > { %835 = vst [vmem:[#allocation5] sm:$0xff] %v833_v47 }
 0x3d7 PF: > { %p1384_p8 = scmp.eq.s32.totalorder %s959_s27, 2  ;;  %s1243_s12 = smov [#allocation3]  }
 0x3d8   : > { %s845_s13 = sshll.u32 %s1243_s12, 4  ;;  %s1244_s14 = smov [#allocation5]   ;;  %s846_s13 = int_to_ptr.vmem [resolvable:$true] %s845_s13 }
 0x3d9   : > { %s858_s15 = sshll.u32 %s1244_s14, 4  ;;  %s1156_s16 = scalar_lea.vmem %s846_s13, 128  ;;  %s859_s15 = int_to_ptr.vmem [resolvable:$true] %s858_s15 }
 0x3da   : > { %p1157_p9 = scmp.ne.s32.totalorder %s846_s13, %s1156_s16  ;;  %p1163_p12 = scmp.lt.s32.totalorder %s846_s13, %s846_s13 }
 0x3db   : > { %p1164_p13 = scmp.lt.s32.totalorder %s1156_s16, %s1156_s16 }
 0x3dc   : > { %p1158_p10 = pnand %p1157_p9, %p1384_p8 }
 0x3dd   : > { %p1165_p0 = por %p1164_p13, %p1163_p12 }
 0x3de   : > { %p1159_p11 = pneg %p1158_p10 }
 0x3e0   : > { %p1166_p1 = pnand %p1165_p0, %p1159_p11 }
 0x3e2   : > { %1169 = shalt.err (!%p1166_p1)
}
 0x3e3   : > { %1077 = dma.vmem_to_hbm [thread:$0]  (%p1384_p8), %s846_s13, 128, %s1425_s6, [#allocation4]  }
 0x3e4   : > { %s1180_s18 = scalar_lea.vmem %s859_s15, 128  ;;  %p1187_p5 = scmp.lt.s32.totalorder %s859_s15, %s859_s15 }
 0x3e5   : > { %p1181_p2 = scmp.ne.s32.totalorder %s859_s15, %s1180_s18  ;;  %p1188_p6 = scmp.lt.s32.totalorder %s1180_s18, %s1180_s18 }
 0x3e7   : > { %p1182_p3 = pnand %p1181_p2, %p1384_p8  ;;  %p1189_p7 = por %p1188_p6, %p1187_p5 }
 0x3e9   : > { %p1183_p4 = pneg %p1182_p3 }
 0x3eb   : > { %p1190_p9 = pnand %p1189_p7, %p1183_p4 }
 0x3ed   : > { %1193 = shalt.err (!%p1190_p9)
}
 0x3ee   : > { %1079 = dma.vmem_to_hbm [thread:$0]  (%p1384_p8), %s859_s15, 128, %s1426_s7, [#allocation6]  }
 0x3ef   : > { %1217 = dma.done.wait (%p1384_p8), [#allocation4], 128  }
 0x3f0   : > { %1219 = vsyncadd (%p1384_p8), [#allocation4], 4294967168 }
 0x3f1   : > { %1221 = dma.done.wait (%p1384_p8), [#allocation6], 128  }
 0x3f2   : > { %1223 = vsyncadd (%p1384_p8), [#allocation6], 4294967168 }
 0x3f3 PF: > { %s20_s26 = sadd.s32 1, %s1234_s26   ;;  %s1428_s24 = smov %s1230_s25 }
 0x3f4   : > { %p17_p10 = scmp.ge.s32.totalorder %s20_s26, 5   ;;  %s1429_s25 = smov %s1431_s28 }
 0x3f6   :  { %19 = sbr.rel (!%p17_p10) target bundleno = 3 (0x3), region = 96 }
 0x3fb   :  { %875 = vsyncpa [#allocation4], 1 }
 0x3fc   :  { %877 = vsyncpa [#allocation4 + $0x1], 1 }
 0x3fd   :  { %878 = vsyncpa [#allocation6], 1 }

</bundles_post_ra>
